<compile_context>
chip_gen: v7x
topology: tpu7x:2x2x1
jax: 0.10.0
libtpu: 0.0.40
codegen_flags: <defaults>
</compile_context>

<pallas_src>
import math

import jax
import jax.numpy as jnp
from jax.experimental import pallas as pl
from jax.experimental.pallas import tpu as pltpu


def _round_up(n, m):
    return ((n + m - 1) // m) * m


def _choose_tile_b(batch, tile_b):
    """Pick the batch tile (lane dim of every block)."""
    if tile_b is not None:
        # Respect the caller, but keep it lane-aligned and capped at 4K rows so the
        # per-layer (128, TILE_B) f32 intermediates stay modest (no inner sub-blocking).
        tile_b = min(max(int(tile_b), 128), 4096)
        return _round_up(tile_b, 128)
    if batch <= 256:
        # Tiny batch: a single small tile; nothing to shard across cores anyway.
        return _round_up(max(batch, 1), 128)
    # Large tiles amortize the ~0.35 us per-grid-step overhead; cap so the grid has
    # at least 2 steps (v7x megacore gets both TensorCores busy) and at 2048 rows.
    half = _round_up((batch + 1) // 2, 256)
    return min(2048, half)


def _make_mlp_kernel(num_linear_layers):
    """Kernel closed over the (static) number of Linear layers."""

    def mlp_kernel(x_ref, *refs):
        # refs = (w0_t, b0, w1_t, b1, ..., wlast_t, blast, o_ref)
        o_ref = refs[-1]
        param_refs = refs[:-1]

        # x_ref: f32 (input_size, TILE_B); batch on lanes.  Cast to the MXU input
        # dtype here (rides on idle VPU slots instead of a wrapper-side XLA pass).
        h = x_ref[...].astype(jnp.bfloat16)
        for i in range(num_linear_layers):
            w_t = param_refs[2 * i][...]      # bf16 (out_pad, in_pad)
            b = param_refs[2 * i + 1][...]    # f32  (out_pad, 1) -> broadcasts over lanes
            acc = jnp.dot(w_t, h, preferred_element_type=jnp.float32) + b
            if i < num_linear_layers - 1:     # ReLU after every Linear except the last
                h = jnp.maximum(acc, 0.0).astype(jnp.bfloat16)
            else:
                h = acc                        # (8, TILE_B) f32, real result in row 0
        # Lane-dense (1, TILE_B) store (full 128-lane vst granules).
        o_ref[...] = h[:1, :].astype(o_ref.dtype)

    return mlp_kernel


def init_params(key, input_size, num_layers, num_neurons):
    """nn.Linear-style init (uniform +-1/sqrt(fan_in)); W stored as (in, out), b as (out,)."""
    dims = [input_size] + [num_neurons] * num_layers + [1]
    params = []
    for i in range(len(dims) - 1):
        key, kw, kb = jax.random.split(key, 3)
        fan_in, fan_out = dims[i], dims[i + 1]
        bound = 1.0 / math.sqrt(fan_in)
        w = jax.random.uniform(kw, (fan_in, fan_out), jnp.float32, -bound, bound)
        b = jax.random.uniform(kb, (fan_out,), jnp.float32, -bound, bound)
        params += [w, b]
    return params


def prepare_params(params):
    """Transpose weights to (out, in), zero-pad hidden widths to 128 lanes and the final
    output rows to 8 sublanes, cast weights to bf16 (biases stay f32, shape (out_pad, 1)).

    Zero padding is mathematically exact: padded hidden units are identically 0 through
    ReLU and contribute 0 to later layers; the padded final rows are never read.
    """
    num = len(params) // 2
    num_neurons = params[0].shape[1]
    hidden_pad = _round_up(max(num_neurons, 1), 128)
    prepared = []
    for i in range(num):
        w = params[2 * i]          # (fan_in, fan_out) f32
        b = params[2 * i + 1]      # (fan_out,) f32
        fan_in, fan_out = w.shape
        in_dim = fan_in if i == 0 else hidden_pad
        out_dim = _round_up(fan_out, 8) if i == num - 1 else hidden_pad
        w_t = jnp.zeros((out_dim, in_dim), jnp.float32).at[:fan_out, :fan_in].set(w.T)
        b_p = jnp.zeros((out_dim, 1), jnp.float32).at[:fan_out, 0].set(b)
        prepared += [w_t.astype(jnp.bfloat16), b_p]
    return prepared


def simple_inflation_predictor(x, prepared_params, *, tile_b=None):
    """Full MLP forward pass in one Pallas kernel, batch-tiled over a 1-D grid.

    x:               (batch, input_size) float32
    prepared_params: flat list from prepare_params()
    returns          (batch, 1) float32
    """
    batch, input_size = x.shape
    num_linear_layers = len(prepared_params) // 2

    tile_b = _choose_tile_b(batch, tile_b)
    padded_batch = _round_up(batch, tile_b)

    # Layout plumbing only (batch onto the lane axis); dtype cast happens in-kernel.
    x_t = x.T
    if padded_batch != batch:
        x_t = jnp.pad(x_t, ((0, 0), (0, padded_batch - batch)))

    kernel = _make_mlp_kernel(num_linear_layers)

    def resident_spec(shape):
        nd = len(shape)
        return pl.BlockSpec(shape, lambda i, _nd=nd: (0,) * _nd)

    grid = (padded_batch // tile_b,)
    in_specs = [pl.BlockSpec((input_size, tile_b), lambda i: (0, i))]
    in_specs += [resident_spec(p.shape) for p in prepared_params]
    out_specs = pl.BlockSpec((1, tile_b), lambda i: (0, i))

    weights = prepared_params[0::2]
    flops = 2 * padded_batch * sum(int(w.shape[0]) * int(w.shape[1]) for w in weights)
    bytes_accessed = (
        int(x_t.size) * x_t.dtype.itemsize
        + sum(int(p.size) * p.dtype.itemsize for p in prepared_params)
        + padded_batch * 4
    )

    out = pl.pallas_call(
        kernel,
        grid_spec=pl.GridSpec(grid=grid, in_specs=in_specs, out_specs=out_specs),
        out_shape=jax.ShapeDtypeStruct((1, padded_batch), jnp.float32),
        compiler_params=pltpu.CompilerParams(
            dimension_semantics=("parallel",),  # independent batch tiles (2 TCs on v7x)
        ),
        cost_estimate=pl.CostEstimate(
            flops=int(flops), transcendentals=0, bytes_accessed=int(bytes_accessed)
        ),
    )(x_t, *prepared_params)

    return out.reshape(padded_batch, 1)[:batch]


def reference_forward(x, params):
    """Pure-f32 JAX reference (mirrors the PyTorch forward exactly)."""
    num = len(params) // 2
    h = x
    for i in range(num):
        h = h @ params[2 * i] + params[2 * i + 1]
        if i < num - 1:
            h = jnp.maximum(h, 0.0)
    return h


def reference_forward_bf16(x, prepared_params):
    """Mirrors the kernel's bf16-operand / f32-accumulate, transposed math (tight tolerance)."""
    num = len(prepared_params) // 2
    h = x.astype(jnp.bfloat16).astype(jnp.float32).T   # (in, batch)
    for i in range(num):
        w_t = prepared_params[2 * i].astype(jnp.float32)
        b = prepared_params[2 * i + 1]
        h = w_t @ h + b
        if i < num - 1:
            h = jnp.maximum(h, 0.0)
            h = h.astype(jnp.bfloat16).astype(jnp.float32)
    return h[:1, :].T                                    # (batch, 1)


if __name__ == "__main__":
    # Small shapes consistent with the module; batch chosen so the default tiling gives
    # a multi-step grid (grid=(2,)) and exercises the batch-padding path.
    batch = 300
    input_size = 8
    num_layers = 2
    num_neurons = 32

    key = jax.random.PRNGKey(0)
    key, kx = jax.random.split(key)
    x = jax.random.normal(kx, (batch, input_size), jnp.float32)

    params = init_params(key, input_size, num_layers, num_neurons)
    prepared = prepare_params(params)

    out = simple_inflation_predictor(x, prepared)
    out = jax.block_until_ready(out)
    assert out.shape == (batch, 1), out.shape

    # Tight check against a reference using identical bf16-rounded operands.
    ref_exact = reference_forward_bf16(x, prepared)
    max_diff = jnp.max(jnp.abs(out - ref_exact))
    assert jnp.allclose(out, ref_exact, atol=1e-3, rtol=1e-3), f"max abs diff {max_diff}"

    # Sanity check against the pure-f32 PyTorch-equivalent forward (bf16 quantization noise only).
    ref_f32 = reference_forward(x, params)
    max_diff_f32 = jnp.max(jnp.abs(out - ref_f32))
    assert jnp.allclose(out, ref_f32, atol=5e-2, rtol=5e-2), f"max abs diff {max_diff_f32}"

    print("KERNEL_OK")
</pallas_src>

<mosaic_0001>
module attributes {stable_mosaic.version = 11 : i64} {
  func.func @mlp_kernel(%arg0: i32, %arg1: memref<8x256xf32, #tpu.memory_space<vmem>>, %arg2: memref<128x8xbf16, #tpu.memory_space<vmem>>, %arg3: memref<128x1xf32, #tpu.memory_space<vmem>>, %arg4: memref<128x128xbf16, #tpu.memory_space<vmem>>, %arg5: memref<128x1xf32, #tpu.memory_space<vmem>>, %arg6: memref<8x128xbf16, #tpu.memory_space<vmem>>, %arg7: memref<8x1xf32, #tpu.memory_space<vmem>>, %arg8: memref<1x256xf32, #tpu.memory_space<vmem>>) attributes {dimension_semantics = [#tpu.dimension_semantics<parallel>], iteration_bounds = array<i64: 2>, scalar_prefetch = 0 : i64, scratch_operands = 0 : i64, tpu.core_type = #tpu.core_type<tc>, window_params = [{transform_indices = @transform_0, window_bounds = array<i64: 8, 256>}, {pipeline_mode = #tpu.pipeline_mode<synchronous>, transform_indices = @transform_1, window_bounds = array<i64: 128, 8>}, {pipeline_mode = #tpu.pipeline_mode<synchronous>, transform_indices = @transform_2, window_bounds = array<i64: 128, 1>}, {pipeline_mode = #tpu.pipeline_mode<synchronous>, transform_indices = @transform_3, window_bounds = array<i64: 128, 128>}, {pipeline_mode = #tpu.pipeline_mode<synchronous>, transform_indices = @transform_4, window_bounds = array<i64: 128, 1>}, {pipeline_mode = #tpu.pipeline_mode<synchronous>, transform_indices = @transform_5, window_bounds = array<i64: 8, 128>}, {pipeline_mode = #tpu.pipeline_mode<synchronous>, transform_indices = @transform_6, window_bounds = array<i64: 8, 1>}, {transform_indices = @transform_7, window_bounds = array<i64: 1, 256>}]} {
    %c0 = arith.constant 0 : index
    %c0_0 = arith.constant 0 : index
    %0 = vector.load %arg1[%c0, %c0_0] : memref<8x256xf32, #tpu.memory_space<vmem>>, vector<8x256xf32>
    %1 = arith.truncf %0 : vector<8x256xf32> to vector<8x256xbf16>
    %c0_1 = arith.constant 0 : index
    %c0_2 = arith.constant 0 : index
    %2 = vector.load %arg2[%c0_1, %c0_2] : memref<128x8xbf16, #tpu.memory_space<vmem>>, vector<128x8xbf16>
    %c0_3 = arith.constant 0 : index
    %c0_4 = arith.constant 0 : index
    %3 = vector.load %arg3[%c0_3, %c0_4] : memref<128x1xf32, #tpu.memory_space<vmem>>, vector<128x1xf32>
    %cst = arith.constant dense<0.000000e+00> : vector<128x256xf32>
    %4 = tpu.matmul %2, %1, %cst {dimension_numbers = #tpu.dot_dimension_numbers<[1], [0], [0], [1], [0, 0, 1, 1], [], []>} : vector<128x8xbf16>, vector<8x256xbf16>, vector<128x256xf32> -> vector<128x256xf32>
    %5 = vector.broadcast %3 : vector<128x1xf32> to vector<128x256xf32>
    %6 = arith.addf %4, %5 : vector<128x256xf32>
    %cst_5 = arith.constant 0.000000e+00 : f32
    %7 = vector.broadcast %cst_5 : f32 to vector<128x256xf32>
    %8 = arith.maximumf %6, %7 : vector<128x256xf32>
    %9 = arith.truncf %8 : vector<128x256xf32> to vector<128x256xbf16>
    %c0_6 = arith.constant 0 : index
    %c0_7 = arith.constant 0 : index
    %10 = vector.load %arg4[%c0_6, %c0_7] : memref<128x128xbf16, #tpu.memory_space<vmem>>, vector<128x128xbf16>
    %c0_8 = arith.constant 0 : index
    %c0_9 = arith.constant 0 : index
    %11 = vector.load %arg5[%c0_8, %c0_9] : memref<128x1xf32, #tpu.memory_space<vmem>>, vector<128x1xf32>
    %cst_10 = arith.constant dense<0.000000e+00> : vector<128x256xf32>
    %12 = tpu.matmul %10, %9, %cst_10 {dimension_numbers = #tpu.dot_dimension_numbers<[1], [0], [0], [1], [0, 0, 1, 1], [], []>} : vector<128x128xbf16>, vector<128x256xbf16>, vector<128x256xf32> -> vector<128x256xf32>
    %13 = vector.broadcast %11 : vector<128x1xf32> to vector<128x256xf32>
    %14 = arith.addf %12, %13 : vector<128x256xf32>
    %cst_11 = arith.constant 0.000000e+00 : f32
    %15 = vector.broadcast %cst_11 : f32 to vector<128x256xf32>
    %16 = arith.maximumf %14, %15 : vector<128x256xf32>
    %17 = arith.truncf %16 : vector<128x256xf32> to vector<128x256xbf16>
    %c0_12 = arith.constant 0 : index
    %c0_13 = arith.constant 0 : index
    %18 = vector.load %arg6[%c0_12, %c0_13] : memref<8x128xbf16, #tpu.memory_space<vmem>>, vector<8x128xbf16>
    %c0_14 = arith.constant 0 : index
    %c0_15 = arith.constant 0 : index
    %19 = vector.load %arg7[%c0_14, %c0_15] : memref<8x1xf32, #tpu.memory_space<vmem>>, vector<8x1xf32>
    %cst_16 = arith.constant dense<0.000000e+00> : vector<8x256xf32>
    %20 = tpu.matmul %18, %17, %cst_16 {dimension_numbers = #tpu.dot_dimension_numbers<[1], [0], [0], [1], [0, 0, 1, 1], [], []>} : vector<8x128xbf16>, vector<128x256xbf16>, vector<8x256xf32> -> vector<8x256xf32>
    %21 = vector.broadcast %19 : vector<8x1xf32> to vector<8x256xf32>
    %22 = arith.addf %20, %21 : vector<8x256xf32>
    %23 = vector.extract_strided_slice %22 {offsets = [0, 0], sizes = [1, 256], strides = [1, 1]} : vector<8x256xf32> to vector<1x256xf32>
    %c0_17 = arith.constant 0 : index
    %c0_18 = arith.constant 0 : index
    %24 = vector.load %arg8[%c0_17, %c0_18] : memref<1x256xf32, #tpu.memory_space<vmem>>, vector<1x256xf32>
    tpu.vector_store %arg8[%c0_17, %c0_18], %23 {strides = array<i32>} : memref<1x256xf32, #tpu.memory_space<vmem>>, vector<1x256xf32>,
    return
  }
  func.func @transform_0(%arg0: i32) -> (i32, i32) {
    %c0_i32 = arith.constant 0 : i32
    %c0_i32_0 = arith.constant 0 : i32
    return %c0_i32, %arg0 : i32, i32
  }
  func.func @transform_1(%arg0: i32) -> (i32, i32) {
    %c0_i32 = arith.constant 0 : i32
    %c0_i32_0 = arith.constant 0 : i32
    %c0_i32_1 = arith.constant 0 : i32
    return %c0_i32, %c0_i32_0 : i32, i32
  }
  func.func @transform_2(%arg0: i32) -> (i32, i32) {
    %c0_i32 = arith.constant 0 : i32
    %c0_i32_0 = arith.constant 0 : i32
    %c0_i32_1 = arith.constant 0 : i32
    return %c0_i32, %c0_i32_0 : i32, i32
  }
  func.func @transform_3(%arg0: i32) -> (i32, i32) {
    %c0_i32 = arith.constant 0 : i32
    %c0_i32_0 = arith.constant 0 : i32
    %c0_i32_1 = arith.constant 0 : i32
    return %c0_i32, %c0_i32_0 : i32, i32
  }
  func.func @transform_4(%arg0: i32) -> (i32, i32) {
    %c0_i32 = arith.constant 0 : i32
    %c0_i32_0 = arith.constant 0 : i32
    %c0_i32_1 = arith.constant 0 : i32
    return %c0_i32, %c0_i32_0 : i32, i32
  }
  func.func @transform_5(%arg0: i32) -> (i32, i32) {
    %c0_i32 = arith.constant 0 : i32
    %c0_i32_0 = arith.constant 0 : i32
    %c0_i32_1 = arith.constant 0 : i32
    return %c0_i32, %c0_i32_0 : i32, i32
  }
  func.func @transform_6(%arg0: i32) -> (i32, i32) {
    %c0_i32 = arith.constant 0 : i32
    %c0_i32_0 = arith.constant 0 : i32
    %c0_i32_1 = arith.constant 0 : i32
    return %c0_i32, %c0_i32_0 : i32, i32
  }
  func.func @transform_7(%arg0: i32) -> (i32, i32) {
    %c0_i32 = arith.constant 0 : i32
    %c0_i32_0 = arith.constant 0 : i32
    return %c0_i32, %arg0 : i32, i32
  }
}

</mosaic_0001>

<bundles_post_ra>
// kernel: tpu_custom_call.1
= control target key start
LH: loop header
LB: loop body
LE: loop exit
PB: predicated region body
PF: predicated region fallthrough
CT: control target
= control target key end

     0   :  { %12 = vsyncpa [#allocation3], 0  ;;  %s1576_s0 = inlined_call_operand.vmem [shape: f32[8,512], index: 0, kind: input, shape index: {}]   ;;  %s1577_s1 = inlined_call_operand.vmem [shape: bf16[128,8], index: 1, kind: input, shape index: {}]   ;;  %s1578_s2 = inlined_call_operand.vmem [shape: f32[128,1], index: 2, kind: input, shape index: {}]   ;;  %s1579_s3 = inlined_call_operand.vmem [shape: bf16[128,128], index: 3, kind: input, shape index: {}]   ;;  %s1580_s4 = inlined_call_operand.vmem [shape: f32[128,1], index: 4, kind: input, shape index: {}]   ;;  %s1581_s5 = inlined_call_operand.vmem [shape: bf16[8,128], index: 5, kind: input, shape index: {}]   ;;  %s1582_s6 = inlined_call_operand.vmem [shape: f32[8,1], index: 6, kind: input, shape index: {}]   ;;  %s1583_s7 = inlined_call_operand.hbm [shape: f32[1,512], index: 7, kind: output, shape index: {}]  }
   0x1   :  { %14 = vsyncpa [#allocation3 + $0x1], 0  ;;  %s1300_s24 = smov 0   ;;  %s1302_s25 = smov 0  }
   0x2   :  { %s1304_s26 = smov 0   ;;  %s1306_s27 = smov 0  }
   0x3 LB: > { %s1321_s28 = sadd.s32 4294967295, %s1255_s27   ;;  %s1096_s29 = sadd.s32 4294967294, %s1255_s27   ;;  %s1255_s27 = sphi %s1306_s27, %s1589_s27   ;;  %s1251_s26 = sphi %s1304_s26, %s1588_s26   ;;  %s1247_s25 = sphi %s1302_s25, %s1587_s25   ;;  %s1243_s24 = sphi %s1300_s24, %s1586_s24  }
   0x4   : > { %s1325_s30 = sadd.s32 1, %s1255_s27   ;;  %s179_s8 = sadd.s32 1, %s1251_s26 }
   0x5   : > { %s176_s9 = ssub.s32 %s1255_s27, %s1325_s30  ;;  %p189_p0 = scmp.ne.s32.totalorder %s1251_s26, %s1247_s25 }
   0x6   : > { %p177_p1 = scmp.eq.s32.totalorder %s176_s9, 0  ;;  %p190_p2 = scmp.eq.s32.totalorder %s1321_s28, 1 }
   0x7   : > { %p195_p3 = scmp.ne.s32.totalorder %s1247_s25, %s1243_s24  ;;  %p196_p4 = scmp.eq.s32.totalorder %s1096_s29, 1 }
   0x8   : > { %s1336_s10 = scalar_select %p177_p1, %s1251_s26, %s179_s8  }
   0x9   : > { %p1338_p5 = por %p190_p2, %p189_p0  ;;  %p1342_p6 = por %p196_p4, %p195_p3 }
   0xa   : > { %p1099_p7 = scmp.ge.s32.totalorder %s1255_s27, 1  ;;  %p241_p8 = scmp.lt.s32.totalorder %s1255_s27, 3 }
   0xc   : > { %p242_p9 = pnand %p1099_p7, %p241_p8 }
   0xd   : > { %s1101_s13 = sshll.u32 (!%p242_p9), %s1321_s28, 1  ;;  %v1257_v0 = vmov (!%p242_p9), 0   ;;  %v301_v1 = vld [vmem:[%s1578_s2] sm:$0xff] (!%p242_p9)  ;;  %vm462_vm0 = vcmask (!%p242_p9), 1043456   ;;  %v302_v6 = vld [vmem:[%s1578_s2 + $0x8] sm:$0xff] (!%p242_p9)  ;;  %v303_v7 = vld [vmem:[%s1578_s2 + $0x10] sm:$0xff] (!%p242_p9) }
   0xe   : > { %245 = sbr.rel (%p242_p9) target bundleno = 828 (0x33c), region = 48  ;;  %p274_p10 = scmp.lt.s32.totalorder (!%p242_p9), %s1101_s13, 3  ;;  %501 = vmatprep.mubr.bf16.mxu0 (!%p242_p9), %v1257_v0  ;;  %1175 = vset.pattern.permute.xlu0 (!%p242_p9), %v1257_v0  ;;  %v1177_v9 = vld [vmem:[%s1577_s1] sm:$0xff] (!%p242_p9)   ;;  %vm437_vm1 = vcmask (!%p242_p9), 64512   ;;  %v304_v10 = vld [vmem:[%s1578_s2 + $0x18] sm:$0xff] (!%p242_p9)  ;;  %v306_v12 = vld [vmem:[%s1578_s2 + $0x28] sm:$0xff] (!%p242_p9) }
   0xf   : > { %1176 = vset.pattern.permute.xlu1 (!%p242_p9), %v1257_v0  ;;  %822 = vmatprep.mubr.bf16.mxu1 (!%p242_p9), %v1257_v0  ;;  %v305_v11 = vld [vmem:[%s1578_s2 + $0x20] sm:$0xff] (!%p242_p9)  ;;  %v307_v13 = vld [vmem:[%s1578_s2 + $0x30] sm:$0xff] (!%p242_p9)  ;;  %v1178_v14 = vld [vmem:[%s1577_s1 + $0x8] sm:$0xff] (!%p242_p9)   ;;  %s270_s20 = sand.u32 (!%p242_p9), 1, %s1247_s25   ;;  %s1133_s22 = sshll.u32 (!%p242_p9), %s1321_s28, 5 }
  0x10   : > { %319 = vperm.xlu0 (!%p242_p9), %1175, %v301_v1   ;;  %329 = vperm.xlu1 (!%p242_p9), %1176, %v303_v7   ;;  %v308_v15 = vld [vmem:[%s1578_s2 + $0x38] sm:$0xff] (!%p242_p9)  ;;  %v309_v16 = vld [vmem:[%s1578_s2 + $0x40] sm:$0xff] (!%p242_p9)  ;;  %v310_v17 = vld [vmem:[%s1578_s2 + $0x48] sm:$0xff] (!%p242_p9)  ;;  %s1100_s21 = sshll.u32 (!%p242_p9), %s270_s20, 1  ;;  %s1259_s28 = smov (!%p242_p9), [#allocation2]  }
  0x11   : > { %v311_v18 = vld [vmem:[%s1578_s2 + $0x50] sm:$0xff] (!%p242_p9)  ;;  %v312_v20 = vld [vmem:[%s1578_s2 + $0x58] sm:$0xff] (!%p242_p9)  ;;  %v313_v21 = vld [vmem:[%s1578_s2 + $0x60] sm:$0xff] (!%p242_p9)  ;;  %s272_s23 = scalar_lea.vmem (!%p242_p9), [#allocation2], %s1100_s21  ;;  %s1197_s16 = sshll.u32 (!%p242_p9), %s1259_s28, 4  ;;  %s1198_s16 = int_to_ptr.vmem [resolvable:$false] %s1197_s16 }
  0x12   : > { %v1179_v19 = vld [vmem:[%s1577_s1 + $0x10] sm:$0xff] (!%p242_p9)   ;;  %v314_v22 = vld [vmem:[%s1578_s2 + $0x68] sm:$0xff] (!%p242_p9)  ;;  %v1180_v24 = vld [vmem:[%s1577_s1 + $0x18] sm:$0xff] (!%p242_p9)   ;;  %s1037_s29 = sshll.u32 (!%p242_p9), %s272_s23, 4  ;;  %s1536_s29 = int_to_ptr.vmem [resolvable:$true] %s1037_s29 }
  0x13   : > { %v315_v23 = vld [vmem:[%s1578_s2 + $0x70] sm:$0xff] (!%p242_p9)  ;;  %v316_v25 = vld [vmem:[%s1578_s2 + $0x78] sm:$0xff] (!%p242_p9)  ;;  %v646_v26 = vld [vmem:[%s1580_s4] sm:$0xff] (!%p242_p9)  ;;  %s1193_s15 = scalar_lea.vmem (!%p242_p9), %s1536_s29, 32  ;;  %p1200_p0 = scmp.lt.s32.totalorder (!%p242_p9), %s1536_s29, %s1198_s16 }
  0x14   : > { %324 = vperm.xlu0 (!%p242_p9), %1175, %v302_v6   ;;  %334 = vperm.xlu1 (!%p242_p9), %1176, %v304_v10   ;;  %v647_v27 = vld [vmem:[%s1580_s4 + $0x8] sm:$0xff] (!%p242_p9)  ;;  %v648_v28 = vld [vmem:[%s1580_s4 + $0x10] sm:$0xff] (!%p242_p9)  ;;  %v1181_v29 = vld [vmem:[%s1577_s1 + $0x20] sm:$0xff] (!%p242_p9)   ;;  %p1194_p11 = scmp.ne.s32.totalorder (!%p242_p9), %s1536_s29, %s1193_s15 }
  0x15   : > { %s1591_s13 = smov (!%p274_p10, %s1101_s13), 3  ;;  %v649_v30 = vld [vmem:[%s1580_s4 + $0x18] sm:$0xff]  ;;  %v650_v31 = vld [vmem:[%s1580_s4 + $0x20] sm:$0xff]  ;;  %v651_v32 = vld [vmem:[%s1580_s4 + $0x28] sm:$0xff] }
  0x16   : > { %s1102_s14 = sshll.u32 %s1591_s13, 3  ;;  %v652_v33 = vld [vmem:[%s1580_s4 + $0x30] sm:$0xff]  ;;  %v1182_v34 = vld [vmem:[%s1577_s1 + $0x28] sm:$0xff]   ;;  %v653_v35 = vld [vmem:[%s1580_s4 + $0x38] sm:$0xff]  ;;  %s1534_s13 = scalar_lea.hbm %s1583_s7, %s1133_s22 }
  0x17   : > { %s277_s17 = scalar_lea.vmem %s1576_s0, %s1102_s14  ;;  %v654_v36 = vld [vmem:[%s1580_s4 + $0x40] sm:$0xff]  ;;  %v655_v37 = vld [vmem:[%s1580_s4 + $0x48] sm:$0xff]  ;;  %v656_v38 = vld [vmem:[%s1580_s4 + $0x50] sm:$0xff]  ;;  %s1023_s14 = scalar_lea.sflag [#allocation3], %s270_s20 }
  0x18   : > { %v282_v2 = vld [vmem:[%s277_s17 + $0x8] sm:$0xff]  ;;  %v281_v3 = vld [vmem:[%s277_s17] sm:$0xff]  ;;  %339 = vperm.xlu0 %1175, %v305_v11   ;;  %344 = vperm.xlu1 %1176, %v306_v12   ;;  %v1183_v39 = vld [vmem:[%s1577_s1 + $0x30] sm:$0xff]   ;;  %p1195_p12 = pnand %p1194_p11, %p1338_p5  ;;  %s1199_s17 = scalar_lea.vmem %s1198_s16, 64 }
  0x19   : > { %v284_v4 = vpack.c.bf16 %v282_v2, %v282_v2  ;;  %v283_v5 = vpack.c.bf16 %v281_v3, %v281_v3  ;;  %v657_v40 = vld [vmem:[%s1580_s4 + $0x58] sm:$0xff]  ;;  %v658_v41 = vld [vmem:[%s1580_s4 + $0x60] sm:$0xff]  ;;  %v659_v42 = vld [vmem:[%s1580_s4 + $0x68] sm:$0xff]  ;;  %p1201_p1 = scmp.lt.s32.totalorder %s1199_s17, %s1193_s15 }
  0x1a   : > { %v660_v43 = vld [vmem:[%s1580_s4 + $0x70] sm:$0xff]  ;;  %v1184_v44 = vld [vmem:[%s1577_s1 + $0x38] sm:$0xff]   ;;  %v952_v46 = vld [vmem:[%s1582_s6] sm:$0xff]  ;;  %p1196_p13 = pneg %p1195_p12 }
  0x1b   : > { %1111 = vmatprep.subr.msk.bf16.mxu0 %vm462_vm0, %v284_v4  ;;  %v464_v8 = vsel %vm462_vm0, %v283_v5, 0  ;;  %v661_v45 = vld [vmem:[%s1580_s4 + $0x78] sm:$0xff]  ;;  %p1202_p2 = por %p1201_p1, %p1200_p0 }
  0x1c   : > { %470 = vmatpush1.bf16.msra.mxu0 %v464_v8  ;;  %349 = vperm.xlu0 %1175, %v307_v13  }
  0x1d   : > { %354 = vperm.xlu1 %1176, %v308_v15   ;;  %p1203_p3 = pnand %p1202_p2, %p1196_p13 }
  0x1f   : > { %1112 = vmatmul.mubr.msk.bf16.vlgmr.msra.gmra.mrb[0].mxu0 %vm437_vm1, %v1177_v9 }
  0x20   : > { %511 = vmatprep.mubr.bf16.mxu0 %v1257_v0  ;;  %359 = vperm.xlu0 %1175, %v309_v16  }
  0x21   : > { %364 = vperm.xlu1 %1176, %v310_v17  }
  0x24   : > { %369 = vperm.xlu0 %1175, %v311_v18  }
  0x25   : > { %374 = vperm.xlu1 %1176, %v312_v20  }
  0x27   : > { %1113 = vmatmul.mubr.msk.bf16.gmra.mrb[4].mxu0 %vm437_vm1, %v1178_v14 }
  0x28   : > { %521 = vmatprep.mubr.bf16.mxu0 %v1257_v0  ;;  %379 = vperm.xlu0 %1175, %v313_v21  }
  0x29   : > { %384 = vperm.xlu1 %1176, %v314_v22  }
  0x2c   : > { %389 = vperm.xlu0 %1175, %v315_v23  }
  0x2d   : > { %394 = vperm.xlu1 %1176, %v316_v25  }
  0x2f   : > { %1114 = vmatmul.mubr.msk.bf16.gmra.mrb[8].mxu0 %vm437_vm1, %v1179_v19 }
  0x30   : > { %531 = vmatprep.mubr.bf16.mxu0 %v1257_v0  ;;  %664 = vperm.xlu0 %1175, %v646_v26  }
  0x31   : > { %669 = vperm.xlu1 %1176, %v647_v27  }
  0x34   : > { %674 = vperm.xlu0 %1175, %v648_v28  }
  0x35   : > { %679 = vperm.xlu1 %1176, %v649_v30  }
  0x37   : > { %1115 = vmatmul.mubr.msk.bf16.gmra.mrb[12].mxu0 %vm437_vm1, %v1180_v24 }
  0x38   : > { %541 = vmatprep.mubr.bf16.mxu0 %v1257_v0  ;;  %684 = vperm.xlu0 %1175, %v650_v31  }
  0x39   : > { %689 = vperm.xlu1 %1176, %v651_v32  }
  0x3c   : > { %694 = vperm.xlu0 %1175, %v652_v33  }
  0x3d   : > { %699 = vperm.xlu1 %1176, %v653_v35  }
  0x3f   : > { %1116 = vmatmul.mubr.msk.bf16.gmra.mrb[16].mxu0 %vm437_vm1, %v1181_v29 }
  0x40   : > { %551 = vmatprep.mubr.bf16.mxu0 %v1257_v0  ;;  %704 = vperm.xlu0 %1175, %v654_v36  }
  0x41   : > { %709 = vperm.xlu1 %1176, %v655_v37  }
  0x44   : > { %714 = vperm.xlu0 %1175, %v656_v38  }
  0x45   : > { %719 = vperm.xlu1 %1176, %v657_v40  }
  0x47   : > { %1117 = vmatmul.mubr.msk.bf16.gmra.mrb[20].mxu0 %vm437_vm1, %v1182_v34 }
  0x48   : > { %561 = vmatprep.mubr.bf16.mxu0 %v1257_v0  ;;  %724 = vperm.xlu0 %1175, %v658_v41  }
  0x49   : > { %729 = vperm.xlu1 %1176, %v659_v42  }
  0x4c   : > { %734 = vperm.xlu0 %1175, %v660_v43  }
  0x4d   : > { %739 = vperm.xlu1 %1176, %v661_v45  }
  0x4f   : > { %1118 = vmatmul.mubr.msk.bf16.gmra.mrb[24].mxu0 %vm437_vm1, %v1183_v39 }
  0x50   : > { %571 = vmatprep.mubr.bf16.mxu0 %v1257_v0  ;;  %955 = vperm.xlu0 %1175, %v952_v46  }
  0x57   : > { %1119 = vmatmul.mubr.msk.bf16.gmra.mrb[28].mxu0 %vm437_vm1, %v1184_v44 }
  0x58   : > { %990 = vmatprep.mubr.bf16.mxu0 %v1257_v0 }
  0x8f   : > { %v320_v47 = vpop.permute.xlu0 %319  ;;  %v330_v56 = vpop.permute.xlu1 %329 }
  0x93   : > { %v325_v51 = vpop.permute.xlu0 %324  ;;  %v335_v4 = vpop.permute.xlu1 %334 }
  0x97   : > { %v340_v15 = vpop.permute.xlu0 %339  ;;  %v345_v20 = vpop.permute.xlu1 %344 }
  0x9b   : > { %v350_v31 = vpop.permute.xlu0 %349 }
  0x9c   : > { %v355_v36 = vpop.permute.xlu1 %354 }
  0xf2   : > { %v503_v48 = vpop.f32.mrb[0].mxu0 }
  0xf3   : > { %v504_v49 = vadd.f32 %v503_v48, %v320_v47  ;;  %v505_v50 = vpop.f32.mrb[1].mxu0 }
  0xf4   : > { %v506_v52 = vadd.f32 %v505_v50, %v320_v47  ;;  %v507_v53 = vpop.f32.mrb[2].mxu0  ;;  %v360_v47 = vpop.permute.xlu0 %359 }
  0xf5   : > { %v508_v54 = vadd.f32 %v507_v53, %v325_v51  ;;  %v509_v55 = vpop.f32.mrb[3].mxu0  ;;  %v582_v58 = vmax.f32 %v504_v49, 0.0 }
  0xf6   : > { %v510_v57 = vadd.f32 %v509_v55, %v325_v51  ;;  %v583_v60 = vmax.f32 %v506_v52, 0.0  ;;  %v365_v52 = vpop.permute.xlu1 %364 }
  0xf7   : > { %v584_v59 = vmax.f32 %v508_v54, 0.0 }
  0xf8   : > { %v585_v61 = vmax.f32 %v510_v57, 0.0 }
  0xf9   : > { %v614_v62 = vpack.c.bf16 %v584_v59, %v582_v58 }
  0xfa   : > { %v513_v63 = vpop.f32.mrb[4].mxu0  ;;  %v615_v1 = vpack.c.bf16 %v585_v61, %v583_v60 }
  0xfb   : > { %v514_v2 = vadd.f32 %v513_v63, %v330_v56  ;;  %v515_v3 = vpop.f32.mrb[5].mxu0  ;;  %v370_v63 = vpop.permute.xlu0 %369 }
  0xfc   : > { %v516_v5 = vadd.f32 %v515_v3, %v330_v56  ;;  %v517_v6 = vpop.f32.mrb[6].mxu0  ;;  %790 = vmatprep.subr.bf16.mxu1 %v615_v1 }
  0xfd   : > { %v518_v7 = vadd.f32 %v517_v6, %v335_v4  ;;  %v519_v8 = vpop.f32.mrb[7].mxu0  ;;  %791 = vmatpush1.bf16.msra.mxu1 %v614_v62  ;;  %v586_v10 = vmax.f32 %v514_v2, 0.0 }
  0xfe   : > { %v520_v9 = vadd.f32 %v519_v8, %v335_v4  ;;  %v587_v12 = vmax.f32 %v516_v5, 0.0  ;;  %v375_v5 = vpop.permute.xlu1 %374 }
  0xff   : > { %v588_v11 = vmax.f32 %v518_v7, 0.0 }
 0x100   : > { %v589_v13 = vmax.f32 %v520_v9, 0.0 }
 0x101   : > { %v616_v14 = vpack.c.bf16 %v588_v11, %v586_v10 }
 0x102   : > { %v617_v16 = vpack.c.bf16 %v589_v13, %v587_v12  ;;  %v523_v17 = vpop.f32.mrb[8].mxu0 }
 0x103   : > { %v524_v18 = vadd.f32 %v523_v17, %v340_v15  ;;  %v525_v19 = vpop.f32.mrb[9].mxu0 }
 0x104   : > { %v526_v21 = vadd.f32 %v525_v19, %v340_v15  ;;  %v527_v22 = vpop.f32.mrb[10].mxu0  ;;  %792 = vmatprep.subr.bf16.mxu1 %v617_v16  ;;  %v380_v16 = vpop.permute.xlu0 %379 }
 0x105   : > { %v528_v23 = vadd.f32 %v527_v22, %v345_v20  ;;  %v529_v24 = vpop.f32.mrb[11].mxu0  ;;  %793 = vmatpush1.bf16.msra.mxu1 %v616_v14  ;;  %v590_v26 = vmax.f32 %v524_v18, 0.0 }
 0x106   : > { %v530_v25 = vadd.f32 %v529_v24, %v345_v20  ;;  %v591_v28 = vmax.f32 %v526_v21, 0.0  ;;  %v385_v21 = vpop.permute.xlu1 %384 }
 0x107   : > { %v592_v27 = vmax.f32 %v528_v23, 0.0 }
 0x108   : > { %v593_v29 = vmax.f32 %v530_v25, 0.0 }
 0x109   : > { %v618_v30 = vpack.c.bf16 %v592_v27, %v590_v26 }
 0x10a   : > { %v619_v32 = vpack.c.bf16 %v593_v29, %v591_v28  ;;  %v533_v33 = vpop.f32.mrb[12].mxu0 }
 0x10b   : > { %v534_v34 = vadd.f32 %v533_v33, %v350_v31  ;;  %v535_v35 = vpop.f32.mrb[13].mxu0 }
 0x10c   : > { %v536_v37 = vadd.f32 %v535_v35, %v350_v31  ;;  %v537_v38 = vpop.f32.mrb[14].mxu0  ;;  %794 = vmatprep.subr.bf16.mxu1 %v619_v32  ;;  %v390_v32 = vpop.permute.xlu0 %389 }
 0x10d   : > { %v538_v39 = vadd.f32 %v537_v38, %v355_v36  ;;  %v539_v40 = vpop.f32.mrb[15].mxu0  ;;  %795 = vmatpush1.bf16.msra.mxu1 %v618_v30  ;;  %v594_v42 = vmax.f32 %v534_v34, 0.0 }
 0x10e   : > { %v540_v41 = vadd.f32 %v539_v40, %v355_v36  ;;  %v595_v44 = vmax.f32 %v536_v37, 0.0  ;;  %v395_v37 = vpop.permute.xlu1 %394 }
 0x10f   : > { %v596_v43 = vmax.f32 %v538_v39, 0.0 }
 0x110   : > { %v597_v45 = vmax.f32 %v540_v41, 0.0 }
 0x111   : > { %v620_v46 = vpack.c.bf16 %v596_v43, %v594_v42 }
 0x112   : > { %v621_v48 = vpack.c.bf16 %v597_v45, %v595_v44  ;;  %v543_v49 = vpop.f32.mrb[16].mxu0 }
 0x113   : > { %v544_v50 = vadd.f32 %v543_v49, %v360_v47  ;;  %v545_v51 = vpop.f32.mrb[17].mxu0  ;;  %v1185_v49 = vld [vmem:[%s1579_s3] sm:$0xff]  }
 0x114   : > { %v546_v53 = vadd.f32 %v545_v51, %v360_v47  ;;  %v547_v54 = vpop.f32.mrb[18].mxu0  ;;  %796 = vmatprep.subr.bf16.mxu1 %v621_v48  ;;  %v1187_v51 = vld [vmem:[%s1579_s3 + $0x10] sm:$0xff]  }
 0x115   : > { %v548_v55 = vadd.f32 %v547_v54, %v365_v52  ;;  %v549_v56 = vpop.f32.mrb[19].mxu0  ;;  %797 = vmatpush1.bf16.msra.mxu1 %v620_v46  ;;  %v598_v58 = vmax.f32 %v544_v50, 0.0  ;;  %v1186_v50 = vld [vmem:[%s1579_s3 + $0x8] sm:$0xff]  }
 0x116   : > { %v550_v57 = vadd.f32 %v549_v56, %v365_v52  ;;  %v599_v60 = vmax.f32 %v546_v53, 0.0  ;;  %v1188_v52 = vld [vmem:[%s1579_s3 + $0x18] sm:$0xff]   ;;  %v1189_v53 = vld [vmem:[%s1579_s3 + $0x20] sm:$0xff]   ;;  %v1190_v54 = vld [vmem:[%s1579_s3 + $0x28] sm:$0xff]  }
 0x117   : > { %v600_v59 = vmax.f32 %v548_v55, 0.0  ;;  %v1191_v55 = vld [vmem:[%s1579_s3 + $0x30] sm:$0xff]   ;;  %v1192_v56 = vld [vmem:[%s1579_s3 + $0x38] sm:$0xff]  }
 0x118   : > { %v601_v61 = vmax.f32 %v550_v57, 0.0  ;;  %v665_v57 = vpop.permute.xlu0 %664 }
 0x119   : > { %v622_v62 = vpack.c.bf16 %v600_v59, %v598_v58 }
 0x11a   : > { %v623_v1 = vpack.c.bf16 %v601_v61, %v599_v60  ;;  %v553_v2 = vpop.f32.mrb[20].mxu0  ;;  %v670_v61 = vpop.permute.xlu1 %669 }
 0x11b   : > { %v554_v3 = vadd.f32 %v553_v2, %v370_v63  ;;  %v555_v4 = vpop.f32.mrb[21].mxu0 }
 0x11c   : > { %v556_v6 = vadd.f32 %v555_v4, %v370_v63  ;;  %v557_v7 = vpop.f32.mrb[22].mxu0  ;;  %798 = vmatprep.subr.bf16.mxu1 %v623_v1 }
 0x11d   : > { %v558_v8 = vadd.f32 %v557_v7, %v375_v5  ;;  %v559_v9 = vpop.f32.mrb[23].mxu0  ;;  %799 = vmatpush1.bf16.msra.mxu1 %v622_v62  ;;  %v602_v11 = vmax.f32 %v554_v3, 0.0 }
 0x11e   : > { %v560_v10 = vadd.f32 %v559_v9, %v375_v5  ;;  %v603_v13 = vmax.f32 %v556_v6, 0.0 }
 0x11f   : > { %v604_v12 = vmax.f32 %v558_v8, 0.0  ;;  %v675_v8 = vpop.permute.xlu0 %674 }
 0x120   : > { %v605_v14 = vmax.f32 %v560_v10, 0.0 }
 0x121   : > { %v624_v15 = vpack.c.bf16 %v604_v12, %v602_v11 }
 0x122   : > { %v625_v17 = vpack.c.bf16 %v605_v14, %v603_v13  ;;  %v563_v18 = vpop.f32.mrb[24].mxu0  ;;  %v680_v13 = vpop.permute.xlu1 %679 }
 0x123   : > { %v564_v19 = vadd.f32 %v563_v18, %v380_v16  ;;  %v565_v20 = vpop.f32.mrb[25].mxu0 }
 0x124   : > { %v566_v22 = vadd.f32 %v565_v20, %v380_v16  ;;  %v567_v23 = vpop.f32.mrb[26].mxu0  ;;  %800 = vmatprep.subr.bf16.mxu1 %v625_v17 }
 0x125   : > { %v568_v24 = vadd.f32 %v567_v23, %v385_v21  ;;  %v569_v25 = vpop.f32.mrb[27].mxu0  ;;  %801 = vmatpush1.bf16.msra.mxu1 %v624_v15  ;;  %v606_v27 = vmax.f32 %v564_v19, 0.0 }
 0x126   : > { %v570_v26 = vadd.f32 %v569_v25, %v385_v21  ;;  %v607_v29 = vmax.f32 %v566_v22, 0.0 }
 0x127   : > { %v608_v28 = vmax.f32 %v568_v24, 0.0  ;;  %v685_v24 = vpop.permute.xlu0 %684 }
 0x128   : > { %v609_v30 = vmax.f32 %v570_v26, 0.0 }
 0x129   : > { %v626_v31 = vpack.c.bf16 %v608_v28, %v606_v27 }
 0x12a   : > { %v627_v33 = vpack.c.bf16 %v609_v30, %v607_v29  ;;  %v573_v34 = vpop.f32.mrb[28].mxu0  ;;  %v690_v29 = vpop.permute.xlu1 %689 }
 0x12b   : > { %v574_v35 = vadd.f32 %v573_v34, %v390_v32  ;;  %v575_v36 = vpop.f32.mrb[29].mxu0 }
 0x12c   : > { %v576_v38 = vadd.f32 %v575_v36, %v390_v32  ;;  %v577_v39 = vpop.f32.mrb[30].mxu0  ;;  %802 = vmatprep.subr.bf16.mxu1 %v627_v33 }
 0x12d   : > { %v578_v40 = vadd.f32 %v577_v39, %v395_v37  ;;  %v579_v41 = vpop.f32.mrb[31].mxu0  ;;  %803 = vmatpush1.bf16.msra.mxu1 %v626_v31  ;;  %v610_v43 = vmax.f32 %v574_v35, 0.0 }
 0x12e   : > { %v580_v42 = vadd.f32 %v579_v41, %v395_v37  ;;  %v611_v45 = vmax.f32 %v576_v38, 0.0 }
 0x12f   : > { %v612_v44 = vmax.f32 %v578_v40, 0.0  ;;  %v695_v40 = vpop.permute.xlu0 %694 }
 0x130   : > { %v613_v46 = vmax.f32 %v580_v42, 0.0 }
 0x131   : > { %v628_v47 = vpack.c.bf16 %v612_v44, %v610_v43 }
 0x132   : > { %v629_v48 = vpack.c.bf16 %v613_v46, %v611_v45  ;;  %v700_v45 = vpop.permute.xlu1 %699 }
 0x134   : > { %804 = vmatprep.subr.bf16.mxu1 %v629_v48 }
 0x135   : > { %805 = vmatpush1.bf16.msra.mxu1 %v628_v47 }
 0x138   : > { %823 = vmatmul.mubr.bf16.vlgmr.msra.gmra.mrb[0].mxu1 %v1185_v49 }
 0x139   : > { %832 = vmatprep.mubr.bf16.mxu1 %v1257_v0 }
 0x140   : > { %833 = vmatmul.mubr.bf16.gmra.mrb[4].mxu1 %v1186_v50 }
 0x141   : > { %842 = vmatprep.mubr.bf16.mxu1 %v1257_v0 }
 0x148   : > { %843 = vmatmul.mubr.bf16.gmra.mrb[8].mxu1 %v1187_v51 }
 0x149   : > { %852 = vmatprep.mubr.bf16.mxu1 %v1257_v0 }
 0x150   : > { %853 = vmatmul.mubr.bf16.gmra.mrb[12].mxu1 %v1188_v52 }
 0x151   : > { %862 = vmatprep.mubr.bf16.mxu1 %v1257_v0 }
 0x158   : > { %863 = vmatmul.mubr.bf16.gmra.mrb[16].mxu1 %v1189_v53 }
 0x159   : > { %872 = vmatprep.mubr.bf16.mxu1 %v1257_v0 }
 0x160   : > { %873 = vmatmul.mubr.bf16.gmra.mrb[20].mxu1 %v1190_v54 }
 0x161   : > { %882 = vmatprep.mubr.bf16.mxu1 %v1257_v0 }
 0x168   : > { %883 = vmatmul.mubr.bf16.gmra.mrb[24].mxu1 %v1191_v55 }
 0x169   : > { %892 = vmatprep.mubr.bf16.mxu1 %v1257_v0 }
 0x170   : > { %893 = vmatmul.mubr.bf16.gmra.mrb[28].mxu1 %v1192_v56  ;;  %v705_v56 = vpop.permute.xlu0 %704 }
 0x20b   : > { %v824_v58 = vpop.f32.mrb[0].mxu1 }
 0x20c   : > { %v825_v59 = vadd.f32 %v824_v58, %v665_v57  ;;  %v826_v60 = vpop.f32.mrb[1].mxu1 }
 0x20d   : > { %v827_v62 = vadd.f32 %v826_v60, %v665_v57  ;;  %v828_v63 = vpop.f32.mrb[2].mxu1 }
 0x20e   : > { %v829_v1 = vadd.f32 %v828_v63, %v670_v61  ;;  %v830_v2 = vpop.f32.mrb[3].mxu1  ;;  %v903_v4 = vmax.f32 %v825_v59, 0.0 }
 0x20f   : > { %v831_v3 = vadd.f32 %v830_v2, %v670_v61  ;;  %v904_v6 = vmax.f32 %v827_v62, 0.0  ;;  %v710_v61 = vpop.permute.xlu1 %709 }
 0x210   : > { %v905_v5 = vmax.f32 %v829_v1, 0.0 }
 0x211   : > { %v906_v7 = vmax.f32 %v831_v3, 0.0 }
 0x212   : > { %v935_v0 = vpack.c.bf16 %v905_v5, %v903_v4 }
 0x213   : > { %v936_v9 = vpack.c.bf16 %v906_v7, %v904_v6  ;;  %v834_v10 = vpop.f32.mrb[4].mxu1 }
 0x214   : > { %v835_v11 = vadd.f32 %v834_v10, %v675_v8  ;;  %v836_v12 = vpop.f32.mrb[5].mxu1 }
 0x215   : > { %v837_v14 = vadd.f32 %v836_v12, %v675_v8  ;;  %v838_v15 = vpop.f32.mrb[6].mxu1  ;;  %958 = vmatprep.subr.bf16.mxu0 %v936_v9  ;;  %v715_v8 = vpop.permute.xlu0 %714 }
 0x216   : > { %v839_v16 = vadd.f32 %v838_v15, %v680_v13  ;;  %v840_v17 = vpop.f32.mrb[7].mxu1  ;;  %959 = vmatpush1.bf16.msra.mxu0 %v935_v0  ;;  %v907_v19 = vmax.f32 %v835_v11, 0.0 }
 0x217   : > { %v841_v18 = vadd.f32 %v840_v17, %v680_v13  ;;  %v908_v21 = vmax.f32 %v837_v14, 0.0  ;;  %v720_v13 = vpop.permute.xlu1 %719 }
 0x218   : > { %v909_v20 = vmax.f32 %v839_v16, 0.0 }
 0x219   : > { %v910_v22 = vmax.f32 %v841_v18, 0.0 }
 0x21a   : > { %v937_v23 = vpack.c.bf16 %v909_v20, %v907_v19 }
 0x21b   : > { %v938_v25 = vpack.c.bf16 %v910_v22, %v908_v21  ;;  %v844_v26 = vpop.f32.mrb[8].mxu1 }
 0x21c   : > { %v845_v27 = vadd.f32 %v844_v26, %v685_v24  ;;  %v846_v28 = vpop.f32.mrb[9].mxu1 }
 0x21d   : > { %v847_v30 = vadd.f32 %v846_v28, %v685_v24  ;;  %v848_v31 = vpop.f32.mrb[10].mxu1  ;;  %960 = vmatprep.subr.bf16.mxu0 %v938_v25  ;;  %v725_v24 = vpop.permute.xlu0 %724 }
 0x21e   : > { %v849_v32 = vadd.f32 %v848_v31, %v690_v29  ;;  %v850_v33 = vpop.f32.mrb[11].mxu1  ;;  %961 = vmatpush1.bf16.msra.mxu0 %v937_v23  ;;  %v911_v35 = vmax.f32 %v845_v27, 0.0 }
 0x21f   : > { %v851_v34 = vadd.f32 %v850_v33, %v690_v29  ;;  %v912_v37 = vmax.f32 %v847_v30, 0.0  ;;  %v730_v29 = vpop.permute.xlu1 %729 }
 0x220   : > { %v913_v36 = vmax.f32 %v849_v32, 0.0 }
 0x221   : > { %v914_v38 = vmax.f32 %v851_v34, 0.0 }
 0x222   : > { %v939_v39 = vpack.c.bf16 %v913_v36, %v911_v35 }
 0x223   : > { %v940_v41 = vpack.c.bf16 %v914_v38, %v912_v37  ;;  %v854_v42 = vpop.f32.mrb[12].mxu1 }
 0x224   : > { %v855_v43 = vadd.f32 %v854_v42, %v695_v40  ;;  %v856_v44 = vpop.f32.mrb[13].mxu1 }
 0x225   : > { %v857_v46 = vadd.f32 %v856_v44, %v695_v40  ;;  %v858_v47 = vpop.f32.mrb[14].mxu1  ;;  %962 = vmatprep.subr.bf16.mxu0 %v940_v41  ;;  %v735_v40 = vpop.permute.xlu0 %734 }
 0x226   : > { %v859_v48 = vadd.f32 %v858_v47, %v700_v45  ;;  %v860_v49 = vpop.f32.mrb[15].mxu1  ;;  %963 = vmatpush1.bf16.msra.mxu0 %v939_v39  ;;  %v915_v51 = vmax.f32 %v855_v43, 0.0 }
 0x227   : > { %v861_v50 = vadd.f32 %v860_v49, %v700_v45  ;;  %v916_v53 = vmax.f32 %v857_v46, 0.0  ;;  %v740_v45 = vpop.permute.xlu1 %739 }
 0x228   : > { %v917_v52 = vmax.f32 %v859_v48, 0.0 }
 0x229   : > { %v918_v54 = vmax.f32 %v861_v50, 0.0 }
 0x22a   : > { %v941_v55 = vpack.c.bf16 %v917_v52, %v915_v51 }
 0x22b   : > { %v942_v57 = vpack.c.bf16 %v918_v54, %v916_v53  ;;  %v864_v58 = vpop.f32.mrb[16].mxu1 }
 0x22c   : > { %v865_v59 = vadd.f32 %v864_v58, %v705_v56  ;;  %v866_v60 = vpop.f32.mrb[17].mxu1  ;;  %v1258_v58 = vmov 1966171168  }
 0x22d   : > { %v867_v62 = vadd.f32 %v866_v60, %v705_v56  ;;  %v868_v63 = vpop.f32.mrb[18].mxu1  ;;  %964 = vmatprep.subr.bf16.mxu0 %v942_v57  ;;  %v951_v57 = vld [vmem:[%s1581_s5] sm:$0xf]  ;;  %v1005_v60 = vlaneseq }
 0x22e   : > { %v869_v1 = vadd.f32 %v868_v63, %v710_v61  ;;  %v870_v2 = vpop.f32.mrb[19].mxu1  ;;  %965 = vmatpush1.bf16.msra.mxu0 %v941_v55  ;;  %v919_v4 = vmax.f32 %v865_v59, 0.0  ;;  %v1003_v59 = vunpack.c.l.s4 %v1258_v58  ;;  %v956_v63 = vpop.permute.xlu0 %955 }
 0x22f   : > { %v871_v3 = vadd.f32 %v870_v2, %v710_v61  ;;  %v920_v6 = vmax.f32 %v867_v62, 0.0  ;;  %v1006_v62 = vshrl.u32 %v1005_v60, 7  ;;  %vm1019_vm2 = vcmp.lt.s32.totalorder %v1005_v60, 256 }
 0x230   : > { %v921_v5 = vmax.f32 %v869_v1, 0.0  ;;  %v1004_v61 = vunpack.c.0.s8 %v1003_v59 }
 0x231   : > { %v922_v7 = vmax.f32 %v871_v3, 0.0 }
 0x232   : > { %v943_v0 = vpack.c.bf16 %v921_v5, %v919_v4  ;;  %v1007_v5 = vsub.s32 %v1004_v61, %v1006_v62 }
 0x233   : > { %v944_v9 = vpack.c.bf16 %v922_v7, %v920_v6  ;;  %v874_v10 = vpop.f32.mrb[20].mxu1 }
 0x234   : > { %v875_v11 = vadd.f32 %v874_v10, %v715_v8  ;;  %v876_v12 = vpop.f32.mrb[21].mxu1 }
 0x235   : > { %v877_v14 = vadd.f32 %v876_v12, %v715_v8  ;;  %v878_v15 = vpop.f32.mrb[22].mxu1  ;;  %966 = vmatprep.subr.bf16.mxu0 %v944_v9 }
 0x236   : > { %v879_v16 = vadd.f32 %v878_v15, %v720_v13  ;;  %v880_v17 = vpop.f32.mrb[23].mxu1  ;;  %967 = vmatpush1.bf16.msra.mxu0 %v943_v0  ;;  %v923_v19 = vmax.f32 %v875_v11, 0.0 }
 0x237   : > { %v881_v18 = vadd.f32 %v880_v17, %v720_v13  ;;  %v924_v21 = vmax.f32 %v877_v14, 0.0 }
 0x238   : > { %v925_v20 = vmax.f32 %v879_v16, 0.0 }
 0x239   : > { %v926_v22 = vmax.f32 %v881_v18, 0.0 }
 0x23a   : > { %v945_v23 = vpack.c.bf16 %v925_v20, %v923_v19 }
 0x23b   : > { %v946_v25 = vpack.c.bf16 %v926_v22, %v924_v21  ;;  %v884_v26 = vpop.f32.mrb[24].mxu1 }
 0x23c   : > { %v885_v27 = vadd.f32 %v884_v26, %v725_v24  ;;  %v886_v28 = vpop.f32.mrb[25].mxu1 }
 0x23d   : > { %v887_v30 = vadd.f32 %v886_v28, %v725_v24  ;;  %v888_v31 = vpop.f32.mrb[26].mxu1  ;;  %968 = vmatprep.subr.bf16.mxu0 %v946_v25 }
 0x23e   : > { %v889_v32 = vadd.f32 %v888_v31, %v730_v29  ;;  %v890_v33 = vpop.f32.mrb[27].mxu1  ;;  %969 = vmatpush1.bf16.msra.mxu0 %v945_v23  ;;  %v927_v35 = vmax.f32 %v885_v27, 0.0 }
 0x23f   : > { %v891_v34 = vadd.f32 %v890_v33, %v730_v29  ;;  %v928_v37 = vmax.f32 %v887_v30, 0.0 }
 0x240   : > { %v929_v36 = vmax.f32 %v889_v32, 0.0 }
 0x241   : > { %v930_v38 = vmax.f32 %v891_v34, 0.0 }
 0x242   : > { %v947_v39 = vpack.c.bf16 %v929_v36, %v927_v35 }
 0x243   : > { %v948_v41 = vpack.c.bf16 %v930_v38, %v928_v37  ;;  %v894_v42 = vpop.f32.mrb[28].mxu1 }
 0x244   : > { %v895_v43 = vadd.f32 %v894_v42, %v735_v40  ;;  %v896_v44 = vpop.f32.mrb[29].mxu1 }
 0x245   : > { %v897_v46 = vadd.f32 %v896_v44, %v735_v40  ;;  %v898_v47 = vpop.f32.mrb[30].mxu1  ;;  %970 = vmatprep.subr.bf16.mxu0 %v948_v41 }
 0x246   : > { %v899_v48 = vadd.f32 %v898_v47, %v740_v45  ;;  %v900_v49 = vpop.f32.mrb[31].mxu1  ;;  %971 = vmatpush1.bf16.msra.mxu0 %v947_v39  ;;  %v931_v51 = vmax.f32 %v895_v43, 0.0 }
 0x247   : > { %v901_v50 = vadd.f32 %v900_v49, %v740_v45  ;;  %v932_v53 = vmax.f32 %v897_v46, 0.0 }
 0x248   : > { %v933_v52 = vmax.f32 %v899_v48, 0.0 }
 0x249   : > { %v934_v54 = vmax.f32 %v901_v50, 0.0 }
 0x24a   : > { %v949_v55 = vpack.c.bf16 %v933_v52, %v931_v51 }
 0x24b   : > { %v950_v56 = vpack.c.bf16 %v934_v54, %v932_v53 }
 0x24d   : > { %972 = vmatprep.subr.bf16.mxu0 %v950_v56 }
 0x24e   : > { %973 = vmatpush1.bf16.msra.mxu0 %v949_v55 }
 0x251   : > { %991 = vmatmul.mubr.bf16.vlgmr.msra.gmra.mrb[32].mxu0 %v951_v57 }
 0x324   : > { %v992_v1 = vpop.f32.mrb[32].mxu0 }
 0x325   : > { %v993_v2 = vadd.f32 %v992_v1, %v956_v63  ;;  %v994_v3 = vpop.f32.mrb[33].mxu0 }
 0x326   : > { %v995_v4 = vadd.f32 %v994_v3, %v956_v63  ;;  %v996_v6 = vpop.f32.mrb[34].mxu0 }
 0x327   : > { %v997_v7 = vpop.f32.mrb[35].mxu0 }
 0x328   : > { %v1001_v0 = vcombine.low %v993_v2, %v995_v4 }
 0x32a   : > { %v1008_v8 = vrot.slane %v1001_v0, %v1007_v5 }
 0x32c   : > { %v1015_v9 = vrot.slane %v1008_v8, %v1007_v5 }
 0x32e   : > { %1021 = vst.msk [vmem:[%s272_s23] sm:$0x3] %vm1019_vm2, %v1015_v9 }
 0x32f   : > { %1206 = shalt.err (!%p1203_p3)
}
 0x330   : > { %s1207_s18 = scalar_lea.hbm %s1534_s13, 32  ;;  %s1211_s21 = scalar_lea.hbm %s1583_s7, 64 }
 0x331   : > { %p1208_p4 = scmp.ne.s32.totalorder %s1534_s13, %s1207_s18  ;;  %p1212_p9 = scmp.lt.u32.totalorder %s1534_s13, %s1583_s7 }
 0x332   : > { %p1213_p10 = scmp.lt.u32.totalorder %s1211_s21, %s1207_s18  ;;  %p1215_p12 = scmp.lt.u32.totalorder %s1207_s18, %s1534_s13 }
 0x333   : > { %p1209_p7 = pnand %p1208_p4, %p1338_p5 }
 0x334   : > { %p1214_p11 = por %p1213_p10, %p1212_p9 }
 0x335   : > { %p1210_p8 = pneg %p1209_p7 }
 0x336   : > { %p1216_p13 = por %p1215_p12, %p1214_p11 }
 0x338   : > { %p1217_p0 = pnand %p1216_p13, %p1210_p8 }
 0x33a   : > { %1220 = shalt.err (!%p1217_p0)
}
 0x33b   : > { %1134 = dma.vmem_to_hbm [thread:$0]  (%p1338_p5), %s1536_s29, 32, %s1534_s13, %s1023_s14  }
 0x33c PF: > { %p1140_p1 = scmp.ge.s32.totalorder %s1255_s27, 2  ;;  %s1049_s8 = sand.u32 1, %s1243_s24  }
 0x33d   : > { %s1050_s9 = scalar_lea.sflag [#allocation3], %s1049_s8 }
 0x33e   : > { %p1137_p2 = pnand %p1140_p1, %p1342_p6 }
 0x340   : > { %1238 = dma.done.wait (!%p1137_p2), %s1050_s9, 32  }
 0x341   : > { %1240 = vsyncadd (!%p1137_p2), %s1050_s9, 4294967264  ;;  %p17_p3 = scmp.ge.s32.totalorder %s1325_s30, 4   ;;  %s1586_s24 = smov %s1247_s25 }
 0x342   : > { %s1587_s25 = smov %s1251_s26  ;;  %s1588_s26 = smov %s1336_s10 }
 0x343   : > { %s1589_s27 = smov %s1325_s30  ;;  %19 = sbr.rel (!%p17_p3) target bundleno = 3 (0x3), region = 83 }
 0x34a   :  { %1055 = vsyncpa [#allocation3], 1 }
 0x34b   :  { %1057 = vsyncpa [#allocation3 + $0x1], 1 }

</bundles_post_ra>
